<compile_context>
chip_gen: v6e
topology: v6e:2x2x1
jax: 0.10.0
libtpu: 0.0.40
codegen_flags: <defaults>
</compile_context>

<pallas_src>
import jax
import jax.numpy as jnp
from jax.experimental import pallas as pl
from jax.experimental.pallas import tpu as pltpu


HIDDEN_DIM = 32
NUM_EMOTIONS = 6
EMOTION_DECAY = 0.95

# ---- packed parameter slab layout: (48 rows, 128 lanes), f32 ----
#   rows  0:32, cols   0: 32  gw1     rows  0:32, cols  96:102  gw2
#   rows  0:32, cols  32: 64  rw1s    rows  0:32, cols 102:108  rw2
#   rows  0:32, cols  64: 96  iws
#   rows 32:38, cols   0: 32  rw1e    rows 32:38, cols  32: 64  iwe
#   row  40   , cols 0:32 gb1 | 32:64 rb1 | 64:96 ib | 96:102 gb2 | 102:108 rb2
SLAB_ROWS = 48
SLAB_COLS = 128
BIAS_ROW = 40

# ---- packed per-step output layout: (B, 128) ----
#   cols 0:32 modified_state | 32:64 influence | 64:70 regulated | 70:76 cur
OUT_COLS = 128


def _simulated_emotions_kernel(cur0_ref, slab_ref, state_ref, out_ref, cur_scratch):
    H, E = HIDDEN_DIM, NUM_EMOTIONS
    t = pl.program_id(0)

    # Initialize the carried emotional-state buffer once (step 0 only).
    @pl.when(t == 0)
    def _():
        cur_scratch[...] = jnp.broadcast_to(cur0_ref[...], cur_scratch.shape)

    x = state_ref[...]                                    # (B, H)
    w_x = slab_ref[0:H, :]                                # (H,128) [gw1|rw1s|iws|gw2|rw2|0]
    w_e = slab_ref[H:H + E, :]                            # (E,128) [rw1e|iwe|0]
    bias = slab_ref[BIAS_ROW:BIAS_ROW + 1, :]             # (1,128) [gb1|rb1|ib|gb2|rb2|0]

    # One fused MXU push for all three x-side matmuls; one vadd applies
    # gb1 / rb1 / ib to their respective column blocks.
    xw = jnp.dot(x, w_x, preferred_element_type=jnp.float32) + bias   # (B,128)

    # ---- emotion_generator: Linear -> ReLU -> Linear -> Softmax ----
    h1 = jnp.maximum(xw[:, 0:H], 0.0)                      # x@gw1 + gb1, ReLU
    # Full-width matmul (no lane-sliced RHS operand); slice the 6-lane result.
    h1w = jnp.dot(h1, w_x, preferred_element_type=jnp.float32) + bias
    logits = h1w[:, 3 * H:3 * H + E]                       # h1@gw2 + gb2
    logits = logits - jnp.max(logits, axis=-1, keepdims=True)
    expd = jnp.exp(logits)
    emotions = expd / jnp.sum(expd, axis=-1, keepdims=True)           # (B, E)

    # ---- regulation_network on cat([state, emotions]) (split matmuls) ----
    ew = jnp.dot(emotions, w_e, preferred_element_type=jnp.float32)   # (B,128)
    r1 = jnp.maximum(xw[:, H:2 * H] + ew[:, 0:H], 0.0)     # + rb1 already in xw
    r1w = jnp.dot(r1, w_x, preferred_element_type=jnp.float32) + bias
    reg_logits = r1w[:, 3 * H + E:3 * H + 2 * E]           # r1@rw2 + rb2
    regulation = jax.nn.sigmoid(reg_logits)
    regulated = emotions * regulation                                  # (B, E)

    # ---- update_emotional_state: decayed buffer carried in VMEM scratch ----
    prev = cur_scratch[...]                                            # (B, E)
    cur = prev * EMOTION_DECAY + regulated * (1.0 - EMOTION_DECAY)
    cur_scratch[...] = cur

    # ---- influence_network on cat([state, current_emotions]) ----
    cw = jnp.dot(cur, w_e, preferred_element_type=jnp.float32)        # (B,128)
    mod = xw[:, 2 * H:3 * H] + cw[:, H:2 * H]              # + ib already in xw

    # ---- lane-dense packed output tile (one writeback DMA per step) ----
    # Pad lanes 76:128 are never read by the wrapper, so no zeros fill.
    out_ref[:, 0:H] = mod
    out_ref[:, H:2 * H] = mod - x
    out_ref[:, 2 * H:2 * H + E] = regulated
    out_ref[:, 2 * H + E:2 * H + 2 * E] = cur


def make_params(key, hidden_dim=HIDDEN_DIM, num_emotions=NUM_EMOTIONS):
    """Deterministic synthetic parameters. Weights stored (in, out)."""
    ks = jax.random.split(key, 12)
    H, E = hidden_dim, num_emotions
    return {
        # emotion_generator
        "gw1": jax.random.normal(ks[0], (H, H), jnp.float32) * 0.1,
        "gb1": jax.random.normal(ks[1], (H,), jnp.float32) * 0.1,
        "gw2": jax.random.normal(ks[2], (H, E), jnp.float32) * 0.1,
        "gb2": jax.random.normal(ks[3], (E,), jnp.float32) * 0.1,
        # regulation_network: first linear takes (H+E) inputs, split state/emotion
        "rw1s": jax.random.normal(ks[4], (H, H), jnp.float32) * 0.1,
        "rw1e": jax.random.normal(ks[5], (E, H), jnp.float32) * 0.1,
        "rb1": jax.random.normal(ks[6], (H,), jnp.float32) * 0.1,
        "rw2": jax.random.normal(ks[7], (H, E), jnp.float32) * 0.1,
        "rb2": jax.random.normal(ks[8], (E,), jnp.float32) * 0.1,
        # influence_network: (H+E) -> H, split input
        "iws": jax.random.normal(ks[9], (H, H), jnp.float32) * 0.1,
        "iwe": jax.random.normal(ks[10], (E, H), jnp.float32) * 0.1,
        "ib": jax.random.normal(ks[11], (H,), jnp.float32) * 0.1,
    }


def pack_param_slab(p):
    """Pack all weights/biases into one (48, 128) f32 slab (done once)."""
    H, E = HIDDEN_DIM, NUM_EMOTIONS
    slab = jnp.zeros((SLAB_ROWS, SLAB_COLS), jnp.float32)
    slab = slab.at[0:H, 0:H].set(p["gw1"])
    slab = slab.at[0:H, H:2 * H].set(p["rw1s"])
    slab = slab.at[0:H, 2 * H:3 * H].set(p["iws"])
    slab = slab.at[0:H, 3 * H:3 * H + E].set(p["gw2"])
    slab = slab.at[0:H, 3 * H + E:3 * H + 2 * E].set(p["rw2"])
    slab = slab.at[H:H + E, 0:H].set(p["rw1e"])
    slab = slab.at[H:H + E, H:2 * H].set(p["iwe"])
    slab = slab.at[BIAS_ROW, 0:H].set(p["gb1"])
    slab = slab.at[BIAS_ROW, H:2 * H].set(p["rb1"])
    slab = slab.at[BIAS_ROW, 2 * H:3 * H].set(p["ib"])
    slab = slab.at[BIAS_ROW, 3 * H:3 * H + E].set(p["gb2"])
    slab = slab.at[BIAS_ROW, 3 * H + E:3 * H + 2 * E].set(p["rb2"])
    return slab


@jax.jit
def simulated_emotions_forward(states, current_emotions, slab):
    """Run T sequential forward steps (T=1 == the original module forward).

    states:           (T, B, H) cognitive states, one per step.
    current_emotions: (1, E) initial registered-buffer value.
    slab:             (48, 128) packed parameters (pack_param_slab).
    Returns per-step (modified_state, metrics), each with a leading T axis.
    """
    T, B, H = states.shape
    E = NUM_EMOTIONS
    packed = pl.pallas_call(
        _simulated_emotions_kernel,
        out_shape=jax.ShapeDtypeStruct((T, B, OUT_COLS), jnp.float32),
        grid_spec=pltpu.PrefetchScalarGridSpec(
            num_scalar_prefetch=0,
            grid=(T,),
            in_specs=[
                # Constant blocks -> DMA'd once, VMEM-resident across the grid.
                pl.BlockSpec((1, E), lambda t: (0, 0)),
                pl.BlockSpec((SLAB_ROWS, SLAB_COLS), lambda t: (0, 0)),
                # One state tile per step.
                pl.BlockSpec((None, B, H), lambda t: (t, 0, 0)),
            ],
            out_specs=pl.BlockSpec((None, B, OUT_COLS), lambda t: (t, 0, 0)),
            # Emotional-state buffer carried across steps.
            scratch_shapes=[pltpu.VMEM((B, E), jnp.float32)],
        ),
        compiler_params=pltpu.CompilerParams(
            dimension_semantics=("arbitrary",)),   # sequential: carries state
    )(current_emotions, slab, states)

    # These slices fuse into the same jit executable (no extra dispatches).
    modified_state = packed[..., 0:H]
    metrics = {
        "emotions": packed[..., 2 * H:2 * H + E],
        "emotion_intensities": packed[..., 2 * H + E:2 * H + 2 * E],
        "emotional_influence": packed[..., H:2 * H],
    }
    return modified_state, metrics


def _reference_forward(states, current_emotions, p):
    """Pure-JAX reference mirroring the PyTorch module, looped over T steps."""
    mods, regs, curs, infls = [], [], [], []
    cur = current_emotions
    for t in range(states.shape[0]):
        s = states[t]
        h1 = jnp.maximum(s @ p["gw1"] + p["gb1"], 0.0)
        emotions = jax.nn.softmax(h1 @ p["gw2"] + p["gb2"], axis=-1)
        r1 = jnp.maximum(s @ p["rw1s"] + emotions @ p["rw1e"] + p["rb1"], 0.0)
        regulation = jax.nn.sigmoid(r1 @ p["rw2"] + p["rb2"])
        regulated = emotions * regulation
        cur = cur * EMOTION_DECAY + regulated * (1.0 - EMOTION_DECAY)
        mod = s @ p["iws"] + cur @ p["iwe"] + p["ib"]
        mods.append(mod)
        regs.append(regulated)
        curs.append(cur)
        infls.append(mod - s)
    return jnp.stack(mods), {
        "emotions": jnp.stack(regs),
        "emotion_intensities": jnp.stack(curs),
        "emotional_influence": jnp.stack(infls),
    }


if __name__ == "__main__":
    key = jax.random.PRNGKey(0)
    k_param, k_state = jax.random.split(key)

    T, B, H, E = 4, 2, HIDDEN_DIM, NUM_EMOTIONS
    params = make_params(k_param, H, E)
    slab = pack_param_slab(params)
    states = jax.random.normal(k_state, (T, B, H), jnp.float32)
    current_emotions = jnp.zeros((1, E), jnp.float32)    # registered buffer init

    mod, metrics = simulated_emotions_forward(states, current_emotions, slab)
    jax.block_until_ready(mod)
    jax.block_until_ready(metrics["emotional_influence"])

    ref_mod, ref_metrics = _reference_forward(states, current_emotions, params)
    assert jnp.allclose(mod, ref_mod, atol=1e-5, rtol=1e-5)
    assert jnp.allclose(metrics["emotions"], ref_metrics["emotions"],
                        atol=1e-5, rtol=1e-5)
    assert jnp.allclose(metrics["emotion_intensities"],
                        ref_metrics["emotion_intensities"], atol=1e-5, rtol=1e-5)
    assert jnp.allclose(metrics["emotional_influence"],
                        ref_metrics["emotional_influence"], atol=1e-5, rtol=1e-5)

    print("KERNEL_OK")
</pallas_src>

<mosaic_0001>
module attributes {stable_mosaic.version = 11 : i64} {
  func.func @_simulated_emotions_kernel(%arg0: i32, %arg1: memref<1x6xf32, #tpu.memory_space<vmem>>, %arg2: memref<48x128xf32, #tpu.memory_space<vmem>>, %arg3: memref<1x2x32xf32, #tpu.memory_space<vmem>>, %arg4: memref<1x2x128xf32, #tpu.memory_space<vmem>>, %arg5: memref<2x6xf32, #tpu.memory_space<vmem>>) attributes {dimension_semantics = [#tpu.dimension_semantics<arbitrary>], iteration_bounds = array<i64: 4>, scalar_prefetch = 0 : i64, scratch_operands = 1 : i64, tpu.core_type = #tpu.core_type<tc>, window_params = [{pipeline_mode = #tpu.pipeline_mode<synchronous>, transform_indices = @transform_0, window_bounds = array<i64: 1, 6>}, {pipeline_mode = #tpu.pipeline_mode<synchronous>, transform_indices = @transform_1, window_bounds = array<i64: 48, 128>}, {transform_indices = @transform_2, window_bounds = array<i64: 1, 2, 32>}, {transform_indices = @transform_3, window_bounds = array<i64: 1, 2, 128>}]} {
    %c0_i32 = arith.constant 0 : i32
    %0 = arith.cmpi eq, %arg0, %c0_i32 : i32
    %1 = arith.extui %0 : i1 to i32
    %c0_i32_0 = arith.constant 0 : i32
    %2 = arith.cmpi ne, %1, %c0_i32_0 : i32
    scf.if %2 {
      %c0_32 = arith.constant 0 : index
      %c0_33 = arith.constant 0 : index
      %67 = vector.load %arg1[%c0_32, %c0_33] : memref<1x6xf32, #tpu.memory_space<vmem>>, vector<1x6xf32>
      %68 = vector.shape_cast %67 : vector<1x6xf32> to vector<1x6xf32>
      %69 = vector.broadcast %68 : vector<1x6xf32> to vector<2x6xf32>
      %c0_34 = arith.constant 0 : index
      %c0_35 = arith.constant 0 : index
      %70 = vector.load %arg5[%c0_34, %c0_35] : memref<2x6xf32, #tpu.memory_space<vmem>>, vector<2x6xf32>
      tpu.vector_store %arg5[%c0_34, %c0_35], %69 {strides = array<i32>} : memref<2x6xf32, #tpu.memory_space<vmem>>, vector<2x6xf32>,
    } else {
    }
    %c0 = arith.constant 0 : index
    %c0_1 = arith.constant 0 : index
    %c0_2 = arith.constant 0 : index
    %3 = vector.load %arg3[%c0, %c0_1, %c0_2] : memref<1x2x32xf32, #tpu.memory_space<vmem>>, vector<1x2x32xf32>
    %4 = vector.shape_cast %3 : vector<1x2x32xf32> to vector<2x32xf32>
    %c0_3 = arith.constant 0 : index
    %c0_4 = arith.constant 0 : index
    %5 = vector.load %arg2[%c0_3, %c0_4] : memref<48x128xf32, #tpu.memory_space<vmem>>, vector<32x128xf32>
    %c32 = arith.constant 32 : index
    %c0_5 = arith.constant 0 : index
    %6 = vector.load %arg2[%c32, %c0_5] : memref<48x128xf32, #tpu.memory_space<vmem>>, vector<6x128xf32>
    %c40 = arith.constant 40 : index
    %c0_6 = arith.constant 0 : index
    %7 = vector.load %arg2[%c40, %c0_6] : memref<48x128xf32, #tpu.memory_space<vmem>>, vector<1x128xf32>
    %cst = arith.constant dense<0.000000e+00> : vector<2x128xf32>
    %8 = tpu.matmul %4, %5, %cst {dimension_numbers = #tpu.dot_dimension_numbers<[1], [0], [0], [1], [0, 0, 1, 1], [], []>} : vector<2x32xf32>, vector<32x128xf32>, vector<2x128xf32> -> vector<2x128xf32>
    %9 = vector.broadcast %7 : vector<1x128xf32> to vector<2x128xf32>
    %10 = arith.addf %8, %9 : vector<2x128xf32>
    %11 = vector.extract_strided_slice %10 {offsets = [0, 0], sizes = [2, 32], strides = [1, 1]} : vector<2x128xf32> to vector<2x32xf32>
    %cst_7 = arith.constant 0.000000e+00 : f32
    %12 = vector.broadcast %cst_7 : f32 to vector<2x32xf32>
    %13 = arith.maximumf %11, %12 : vector<2x32xf32>
    %cst_8 = arith.constant dense<0.000000e+00> : vector<2x128xf32>
    %14 = tpu.matmul %13, %5, %cst_8 {dimension_numbers = #tpu.dot_dimension_numbers<[1], [0], [0], [1], [0, 0, 1, 1], [], []>} : vector<2x32xf32>, vector<32x128xf32>, vector<2x128xf32> -> vector<2x128xf32>
    %15 = vector.broadcast %7 : vector<1x128xf32> to vector<2x128xf32>
    %16 = arith.addf %14, %15 : vector<2x128xf32>
    %17 = vector.extract_strided_slice %16 {offsets = [0, 96], sizes = [2, 6], strides = [1, 1]} : vector<2x128xf32> to vector<2x6xf32>
    %cst_9 = arith.constant dense<0xFF800000> : vector<2xf32>
    %18 = vector.multi_reduction <maximumf>, %17, %cst_9 [1] : vector<2x6xf32> to vector<2xf32>
    %19 = vector.shape_cast %18 : vector<2xf32> to vector<2x1xf32>
    %20 = vector.broadcast %19 : vector<2x1xf32> to vector<2x6xf32>
    %21 = arith.subf %17, %20 : vector<2x6xf32>
    %22 = math.exp %21 : vector<2x6xf32>
    %cst_10 = arith.constant dense<0.000000e+00> : vector<2xf32>
    %23 = vector.multi_reduction <add>, %22, %cst_10 [1] : vector<2x6xf32> to vector<2xf32>
    %24 = vector.shape_cast %23 : vector<2xf32> to vector<2x1xf32>
    %25 = vector.broadcast %24 : vector<2x1xf32> to vector<2x6xf32>
    %26 = arith.divf %22, %25 : vector<2x6xf32>
    %cst_11 = arith.constant dense<0.000000e+00> : vector<2x128xf32>
    %27 = tpu.matmul %26, %6, %cst_11 {dimension_numbers = #tpu.dot_dimension_numbers<[1], [0], [0], [1], [0, 0, 1, 1], [], []>} : vector<2x6xf32>, vector<6x128xf32>, vector<2x128xf32> -> vector<2x128xf32>
    %28 = vector.extract_strided_slice %10 {offsets = [0, 32], sizes = [2, 32], strides = [1, 1]} : vector<2x128xf32> to vector<2x32xf32>
    %29 = vector.extract_strided_slice %27 {offsets = [0, 0], sizes = [2, 32], strides = [1, 1]} : vector<2x128xf32> to vector<2x32xf32>
    %30 = arith.addf %28, %29 : vector<2x32xf32>
    %cst_12 = arith.constant 0.000000e+00 : f32
    %31 = vector.broadcast %cst_12 : f32 to vector<2x32xf32>
    %32 = arith.maximumf %30, %31 : vector<2x32xf32>
    %cst_13 = arith.constant dense<0.000000e+00> : vector<2x128xf32>
    %33 = tpu.matmul %32, %5, %cst_13 {dimension_numbers = #tpu.dot_dimension_numbers<[1], [0], [0], [1], [0, 0, 1, 1], [], []>} : vector<2x32xf32>, vector<32x128xf32>, vector<2x128xf32> -> vector<2x128xf32>
    %34 = vector.broadcast %7 : vector<1x128xf32> to vector<2x128xf32>
    %35 = arith.addf %33, %34 : vector<2x128xf32>
    %36 = vector.extract_strided_slice %35 {offsets = [0, 102], sizes = [2, 6], strides = [1, 1]} : vector<2x128xf32> to vector<2x6xf32>
    %37 = arith.negf %36 : vector<2x6xf32>
    %38 = math.exp %37 : vector<2x6xf32>
    %cst_14 = arith.constant 1.000000e+00 : f32
    %39 = vector.broadcast %cst_14 : f32 to vector<2x6xf32>
    %40 = arith.addf %39, %38 : vector<2x6xf32>
    %41 = arith.divf %39, %40 : vector<2x6xf32>
    %42 = arith.mulf %26, %41 : vector<2x6xf32>
    %c0_15 = arith.constant 0 : index
    %c0_16 = arith.constant 0 : index
    %43 = vector.load %arg5[%c0_15, %c0_16] : memref<2x6xf32, #tpu.memory_space<vmem>>, vector<2x6xf32>
    %cst_17 = arith.constant 0.949999988 : f32
    %44 = vector.broadcast %cst_17 : f32 to vector<2x6xf32>
    %45 = arith.mulf %43, %44 : vector<2x6xf32>
    %cst_18 = arith.constant 5.000000e-02 : f32
    %46 = vector.broadcast %cst_18 : f32 to vector<2x6xf32>
    %47 = arith.mulf %42, %46 : vector<2x6xf32>
    %48 = arith.addf %45, %47 : vector<2x6xf32>
    %c0_19 = arith.constant 0 : index
    %c0_20 = arith.constant 0 : index
    %49 = vector.load %arg5[%c0_19, %c0_20] : memref<2x6xf32, #tpu.memory_space<vmem>>, vector<2x6xf32>
    tpu.vector_store %arg5[%c0_19, %c0_20], %48 {strides = array<i32>} : memref<2x6xf32, #tpu.memory_space<vmem>>, vector<2x6xf32>,
    %cst_21 = arith.constant dense<0.000000e+00> : vector<2x128xf32>
    %50 = tpu.matmul %48, %6, %cst_21 {dimension_numbers = #tpu.dot_dimension_numbers<[1], [0], [0], [1], [0, 0, 1, 1], [], []>} : vector<2x6xf32>, vector<6x128xf32>, vector<2x128xf32> -> vector<2x128xf32>
    %51 = vector.extract_strided_slice %10 {offsets = [0, 64], sizes = [2, 32], strides = [1, 1]} : vector<2x128xf32> to vector<2x32xf32>
    %52 = vector.extract_strided_slice %50 {offsets = [0, 32], sizes = [2, 32], strides = [1, 1]} : vector<2x128xf32> to vector<2x32xf32>
    %53 = arith.addf %51, %52 : vector<2x32xf32>
    %c0_22 = arith.constant 0 : index
    %c0_23 = arith.constant 0 : index
    %c0_24 = arith.constant 0 : index
    %54 = vector.load %arg4[%c0_22, %c0_23, %c0_24] : memref<1x2x128xf32, #tpu.memory_space<vmem>>, vector<1x2x32xf32>
    %55 = vector.shape_cast %54 : vector<1x2x32xf32> to vector<2x32xf32>
    %56 = vector.shape_cast %53 : vector<2x32xf32> to vector<1x2x32xf32>
    tpu.vector_store %arg4[%c0_22, %c0_23, %c0_24], %56 {strides = array<i32>} : memref<1x2x128xf32, #tpu.memory_space<vmem>>, vector<1x2x32xf32>,
    %57 = arith.subf %53, %4 : vector<2x32xf32>
    %c0_25 = arith.constant 0 : index
    %c0_26 = arith.constant 0 : index
    %c32_27 = arith.constant 32 : index
    %58 = vector.load %arg4[%c0_25, %c0_26, %c32_27] : memref<1x2x128xf32, #tpu.memory_space<vmem>>, vector<1x2x32xf32>
    %59 = vector.shape_cast %58 : vector<1x2x32xf32> to vector<2x32xf32>
    %60 = vector.shape_cast %57 : vector<2x32xf32> to vector<1x2x32xf32>
    tpu.vector_store %arg4[%c0_25, %c0_26, %c32_27], %60 {strides = array<i32>} : memref<1x2x128xf32, #tpu.memory_space<vmem>>, vector<1x2x32xf32>,
    %c0_28 = arith.constant 0 : index
    %c0_29 = arith.constant 0 : index
    %c64 = arith.constant 64 : index
    %61 = vector.load %arg4[%c0_28, %c0_29, %c64] : memref<1x2x128xf32, #tpu.memory_space<vmem>>, vector<1x2x6xf32>
    %62 = vector.shape_cast %61 : vector<1x2x6xf32> to vector<2x6xf32>
    %63 = vector.shape_cast %42 : vector<2x6xf32> to vector<1x2x6xf32>
    tpu.vector_store %arg4[%c0_28, %c0_29, %c64], %63 {strides = array<i32>} : memref<1x2x128xf32, #tpu.memory_space<vmem>>, vector<1x2x6xf32>,
    %c0_30 = arith.constant 0 : index
    %c0_31 = arith.constant 0 : index
    %c70 = arith.constant 70 : index
    %64 = vector.load %arg4[%c0_30, %c0_31, %c70] : memref<1x2x128xf32, #tpu.memory_space<vmem>>, vector<1x2x6xf32>
    %65 = vector.shape_cast %64 : vector<1x2x6xf32> to vector<2x6xf32>
    %66 = vector.shape_cast %48 : vector<2x6xf32> to vector<1x2x6xf32>
    tpu.vector_store %arg4[%c0_30, %c0_31, %c70], %66 {strides = array<i32>} : memref<1x2x128xf32, #tpu.memory_space<vmem>>, vector<1x2x6xf32>,
    return
  }
  func.func @transform_0(%arg0: i32) -> (i32, i32) {
    %c0_i32 = arith.constant 0 : i32
    %c0_i32_0 = arith.constant 0 : i32
    %c0_i32_1 = arith.constant 0 : i32
    return %c0_i32, %c0_i32_0 : i32, i32
  }
  func.func @transform_1(%arg0: i32) -> (i32, i32) {
    %c0_i32 = arith.constant 0 : i32
    %c0_i32_0 = arith.constant 0 : i32
    %c0_i32_1 = arith.constant 0 : i32
    return %c0_i32, %c0_i32_0 : i32, i32
  }
  func.func @transform_2(%arg0: i32) -> (i32, i32, i32) {
    %c0_i32 = arith.constant 0 : i32
    %c0_i32_0 = arith.constant 0 : i32
    %c0_i32_1 = arith.constant 0 : i32
    return %arg0, %c0_i32, %c0_i32_0 : i32, i32, i32
  }
  func.func @transform_3(%arg0: i32) -> (i32, i32, i32) {
    %c0_i32 = arith.constant 0 : i32
    %c0_i32_0 = arith.constant 0 : i32
    %c0_i32_1 = arith.constant 0 : i32
    return %arg0, %c0_i32, %c0_i32_0 : i32, i32, i32
  }
}

</mosaic_0001>

<bundles_post_ra>
// kernel: simulated_emotions_forward.1
= control target key start
LH: loop header
LB: loop body
LE: loop exit
PB: predicated region body
PF: predicated region fallthrough
CT: control target
= control target key end

     0   :  { %8 = vsyncpa [#allocation4], 0  ;;  %s1210_s0 = inlined_call_operand.vmem [shape: f32[1,6], index: 0, kind: input, shape index: {}]   ;;  %s1211_s1 = inlined_call_operand.hbm [shape: f32[48,128], index: 1, kind: input, shape index: {}]   ;;  %s1212_s2 = inlined_call_operand.hbm [shape: f32[4,2,32], index: 2, kind: input, shape index: {}]   ;;  %s1213_s3 = inlined_call_operand.vmem [shape: f32[4,2,128], index: 3, kind: output, shape index: {}]  }
   0x1   :  { %9 = vsyncpa [#allocation6], 0 }
   0x2   :  { %11 = vsyncpa [#allocation6 + $0x1], 0  ;;  %s1030_s12 = smov 0   ;;  %s1032_s13 = smov 0  }
   0x3   :  { %s1034_s14 = smov 0   ;;  %s1036_s15 = smov 0  }
   0x4 LB: > { %s1049_s16 = sadd.s32 4294967295, %s997_s15   ;;  %p79_p0 = scmp.ne.s32.totalorder %s989_s13, %s985_s12  ;;  %s997_s15 = sphi %s1036_s15, %s1229_s15   ;;  %s993_s14 = sphi %s1034_s14, %s1228_s14   ;;  %s989_s13 = sphi %s1032_s13, %s1227_s13   ;;  %s985_s12 = sphi %s1030_s12, %s1226_s12  }
   0x5   : > { %p1214_p1 = scmp.eq.s32.totalorder %s1049_s16, 0  ;;  %p754_p2 = scmp.ge.s32.totalorder %s997_s15, 1 }
   0x6   : > { %p116_p3 = scmp.lt.s32.totalorder %s997_s15, 5  ;;  %s999_s19 = smov [#allocation3]  }
   0x7   : > { %p1058_p5 = por %p1214_p1, %p79_p0  ;;  %s131_s20 = sshll.u32 %s999_s19, 4  ;;  %s132_s20 = int_to_ptr.vmem [resolvable:$true] %s131_s20 }
   0x8   : > { %p1062_p6 = pnand %p754_p2, %p116_p3  ;;  %s1075_s22 = sadd.s32 1, %s997_s15  }
   0x9   : > { %s1217_s17 = scalar_select %p1058_p5, 1, 0 }
   0xa   : > { %s1218_s18 = scalar_select %p1062_p6, 1, 0 }
   0xb   : > { %p844_p7 = pneg %p1062_p6  ;;  %s66_s23 = sadd.s32 1, %s993_s14 }
   0xc   : > { %s63_s24 = ssub.s32 %s997_s15, %s1075_s22  ;;  %s916_s25 = scalar_lea.vmem %s132_s20, 768 }
   0xd   : > { %p1070_p8 = pnand %p844_p7, %p1214_p1  ;;  %p917_p10 = scmp.ne.s32.totalorder %s132_s20, %s916_s25 }
   0xe   : > { %p924_p13 = scmp.lt.s32.totalorder %s132_s20, %s132_s20  ;;  %p925_p0 = scmp.lt.s32.totalorder %s916_s25, %s916_s25 }
   0xf   : > { %p907_p9 = pneg %p1070_p8 }
  0x10   : > { %p926_p2 = por %p925_p0, %p924_p13 }
  0x11   : > { %p919_p11 = pnand %p917_p10, %p907_p9 }
  0x13   : > { %p920_p12 = pneg %p919_p11 }
  0x15   : > { %p927_p3 = pnand %p926_p2, %p920_p12 }
  0x17   : > { %930 = shalt.err (!%p927_p3)
}
  0x18   : > { %s1000_s26 = smov 128   ;;  %s1001_s27 = smov 8  }
  0x19   : > { %847 = dma.hbm_to_vmem [thread:$0]  (!%p1070_p8), %s1211_s1, 768, %s132_s20, [#allocation4], %s1000_s26, %s1000_s26, %s1001_s27  }
  0x1a   : > { %p64_p7 = scmp.eq.s32.totalorder %s63_s24, 0  ;;  %p73_p9 = scmp.ne.s32.totalorder %s993_s14, %s989_s13 }
  0x1b   : > { %p74_p10 = scmp.eq.s32.totalorder %s997_s15, 0  ;;  %p853_p11 = scmp.lt.s32.totalorder %s997_s15, 4 }
  0x1c   : > { %s1092_s30 = scalar_select %p64_p7, %s993_s14, %s66_s23  }
  0x1d   : > { %p75_p12 = por %p74_p10, %p73_p9  ;;  %s145_s4 = sand.u32 1, %s993_s14  }
  0x1e   : > { %s757_s5 = sshll.u32 %s145_s4, 1  ;;  %s758_s6 = sshll.u32 %s997_s15, 5 }
  0x1f   : > { %s1099_s9 = scalar_lea.hbm %s1212_s2, %s758_s6  ;;  %s149_s10 = scalar_lea.vmem [#allocation5], %s757_s5 }
  0x20   : > { %s156_s11 = sshll.u32 %s149_s10, 4  ;;  %p1101_p8 = pnand %p853_p11, %p75_p12  ;;  %s157_s11 = int_to_ptr.vmem [resolvable:$true] %s156_s11 }
  0x21   : > { %s146_s19 = scalar_lea.sflag [#allocation6], %s145_s4  ;;  %s931_s20 = scalar_lea.hbm %s1099_s9, 32 }
  0x22   : > { %p932_p13 = scmp.ne.s32.totalorder %s1099_s9, %s931_s20  ;;  %p933_p0 = pneg %p1101_p8 }
  0x23   : > { %s936_s23 = scalar_lea.hbm %s1212_s2, 128  ;;  %p937_p7 = scmp.lt.s32.totalorder %s1099_s9, %s1212_s2 }
  0x24   : > { %p934_p2 = pnand %p933_p0, %p932_p13  ;;  %p938_p9 = scmp.lt.s32.totalorder %s936_s23, %s931_s20 }
  0x26   : > { %p935_p3 = pneg %p934_p2  ;;  %p939_p10 = por %p938_p9, %p937_p7 }
  0x28   : > { %p940_p11 = pnand %p939_p10, %p935_p3 }
  0x2a   : > { %943 = shalt.err (!%p940_p11)
}
  0x2b   : > { %s944_s26 = scalar_lea.vmem %s157_s11, 32  ;;  %s1002_s27 = smov [#allocation5]  }
  0x2c   : > { %p945_p12 = scmp.ne.s32.totalorder %s157_s11, %s944_s26  ;;  %s949_s28 = sshll.u32 %s1002_s27, 4  ;;  %s950_s28 = int_to_ptr.vmem [resolvable:$false] %s949_s28 }
  0x2d   : > { %s951_s29 = scalar_lea.vmem %s950_s28, 64  ;;  %p952_p13 = scmp.lt.s32.totalorder %s157_s11, %s950_s28 }
  0x2e   : > { %p947_p4 = pnand %p945_p12, %p933_p0  ;;  %p953_p2 = scmp.lt.s32.totalorder %s951_s29, %s944_s26 }
  0x30   : > { %p948_p1 = pneg %p947_p4  ;;  %p954_p5 = por %p953_p2, %p952_p13 }
  0x32   : > { %p955_p6 = pnand %p954_p5, %p948_p1 }
  0x34   : > { %958 = shalt.err (!%p955_p6)
}
  0x35   : > { %851 = dma.hbm_to_vmem [thread:$0]  (!%p1101_p8), %s1099_s9, 32, %s157_s11, %s146_s19  }
  0x36   : > { %p1221_p3 = scmp.ne.s32.totalorder %s1218_s18, 0 }
  0x37   : > { %p1222_p7 = scmp.eq.s32.totalorder (!%p1221_p3), %s1049_s16, 0 }
  0x38   : > { %165 = sbr.rel (%p1221_p3) target bundleno = 2341 (0x925), region = 32 }
  0x3d   : > { %976 = dma.done.wait (%p1222_p7), [#allocation4], 768   ;;  %p1223_p4 = pmov %p1222_p7 }
  0x3e   : > { %s171_s4 = sand.u32 1, %s989_s13   ;;  %p1224_p1 = scmp.ne.s32.totalorder %s1217_s17, 0 }
  0x3f   : > { %978 = vsyncadd (%p1223_p4), [#allocation4], 4294966528  ;;  %s1126_s5 = sshll.u32 %s171_s4, 1  ;;  %s172_s6 = scalar_lea.sflag [#allocation6], %s171_s4 }
  0x40   : > { %s175_s7 = scalar_lea.vmem [#allocation5], %s1126_s5 }
  0x41   : > { %980 = dma.done.wait (%p1224_p1), %s172_s6, 32  }
  0x42   : > { %982 = vsyncadd (%p1224_p1), %s172_s6, 4294967264  ;;  %p197_p5 = scmp.lt.s32.totalorder %s1049_s16, 3  ;;  %p1225_p6 = scmp.ne.s32.totalorder %s1049_s16, 0 }
  0x44   : > { %s198_s18 = scalar_select %p197_p5, %s1049_s16, 3 }
  0x45   : > { %204 = sbr.rel (%p1225_p6) target bundleno = 76 (0x4c), region = 44 }
  0x46   : > { %s762_s8 = sshll.u32 %s198_s18, 1 }
  0x47   : > { %s1138_s11 = scalar_lea.vmem %s1213_s3, %s762_s8 }
  0x4a   : > { %v764_v0 = vld [vmem:[%s1210_s0] ss:$0 sm:$0xff]  ;;  %vm212_vm0 = vcmask 41984  }
  0x4b   : > { %213 = vst.msk [vmem:[#allocation2] sm:$0x3] %vm212_vm0, %v764_v0 }
  0x4c PF: > { %v218_v1 = vld [vmem:[#allocation3 + $0x18] sm:$0xff]  ;;  %v1003_v2 = vmov 0.0   ;;  %v217_v3 = vld [vmem:[#allocation3 + $0x10] sm:$0xff]  ;;  %vm1004_vm1 = vmmov 0   ;;  %v216_v4 = vld [vmem:[#allocation3 + $0x8] sm:$0xff]  ;;  %vm225_vm2 = vcmask 261120  }
  0x4d   : > { %795 = vmatprep.subr.mxu0 %v1003_v2  ;;  %803 = vmatprep.mubr.msk.f32.mxu0 %vm1004_vm1, %v1003_v2  ;;  %v215_v5 = vld [vmem:[#allocation3] sm:$0xff]  ;;  %v1152_v6 = vld [vmem:[%s175_s7] sm:$0x3]  ;;  %v765_v7 = vld [vmem:[#allocation3 + $0x28] ss:$0 sm:$0xff]  ;;  %vm373_vm3 = vcmask 829184  }
  0x4e   : > { %796 = vmatpush3.msra.mxu0 %v218_v1  ;;  %806 = vmatprep.subr.mxu1 %v1003_v2  ;;  %s1005_s16 = smov 32   ;;  %vm384_vm4 = vcmask 41984   ;;  %v219_v22 = vld [vmem:[#allocation3 + $0x20] sm:$0x3f]  ;;  %vm396_vm5 = vcmask 1045504   ;;  %vm393_vm6 = vcmask 48128  }
  0x4f   : > { %797 = vmatprep.subr.mxu0 %v1003_v2  ;;  %807 = vmatpush3.msra.mxu1 %v218_v1  ;;  %s1006_s17 = smov 96   ;;  %s1007_s20 = smov 122   ;;  %vm653_vm7 = vcmask 254976   ;;  %vm663_vm8 = vcmask 517376   ;;  %vm669_vm9 = vcmask 566784   ;;  %vm674_vm10 = vcmask 615984  }
  0x50   : > { %798 = vmatpush3.msra.mxu0 %v217_v3  ;;  %808 = vmatprep.subr.mxu1 %v1003_v2  ;;  %s1008_s15 = smov 64   ;;  %s1009_s21 = smov 70  }
  0x51   : > { %799 = vmatprep.subr.mxu0 %v1003_v2  ;;  %809 = vmatpush3.msra.mxu1 %v217_v3 }
  0x52   : > { %800 = vmatpush3.msra.mxu0 %v216_v4  ;;  %810 = vmatprep.subr.mxu1 %v1003_v2  ;;  %v562_v43 = vld [vmem:[#allocation2] sm:$0x3] }
  0x53   : > { %801 = vmatprep.subr.mxu0 %v1003_v2  ;;  %811 = vmatpush3.msra.mxu1 %v216_v4  ;;  %v563_v44 = vmul.f32 0.95, %v562_v43 }
  0x54   : > { %802 = vmatpush3.msra.mxu0 %v215_v5  ;;  %812 = vmatprep.subr.mxu1 %v1003_v2 }
  0x55   : > { %804 = vmatmul.mubr.msk.f32.vlgmr.msra.gmra.mxu0 %vm225_vm2, %v1152_v6  ;;  %813 = vmatpush3.msra.mxu1 %v215_v5 }
  0x56   : > { %814 = vmatprep.mubr.msk.f32.mxu1 %vm1004_vm1, %v1003_v2  ;;  %817 = vmatprep.subr.mxu0 %v1003_v2 }
  0x57   : > { %819 = vmatprep.mubr.msk.f32.mxu0 %vm1004_vm1, %v1003_v2  ;;  %822 = vmatprep.subr.mxu1 %v1003_v2 }
  0x58   : > { %818 = vmatpush3.msk.msra.mxu0 %vm396_vm5, %v219_v22 }
  0x59   : > { %833 = vmatprep.subr.mxu0 %v1003_v2 }
 0x115   : > { %v295_v8 = vpop.f32.mrf.mxu0 }
 0x116   : > { %v1165_v9 = vadd.f32 %v765_v7, %v295_v8 }
 0x117   : > { %v805_v10 = vpop.f32.mrf.mxu0 }
 0x118   : > { %v299_v11 = vmax.f32 %v1165_v9, 0.0 }
 0x11a   : > { %815 = vmatmul.mubr.msk.f32.vlgmr.msra.gmra.mxu1 %vm225_vm2, %v299_v11 }
 0x11b   : > { %823 = vmatpush3.msra.mxu1 %v218_v1  ;;  %830 = vmatprep.mubr.msk.f32.mxu1 %vm1004_vm1, %v1003_v2 }
 0x11c   : > { %824 = vmatprep.subr.mxu1 %v1003_v2 }
 0x11d   : > { %825 = vmatpush3.msra.mxu1 %v217_v3 }
 0x11e   : > { %826 = vmatprep.subr.mxu1 %v1003_v2 }
 0x11f   : > { %827 = vmatpush3.msra.mxu1 %v216_v4 }
 0x120   : > { %828 = vmatprep.subr.mxu1 %v1003_v2 }
 0x121   : > { %829 = vmatpush3.msra.mxu1 %v215_v5 }
 0x1da   : > { %v369_v12 = vpop.f32.mrf.mxu1 }
 0x1db   : > { %v370_v13 = vadd.f32 %v765_v7, %v369_v12 }
 0x1dc   : > { %v816_v14 = vpop.f32.mrf.mxu1 }
 0x1dd   : > { %v374_v15 = vsel %vm373_vm3, %v370_v13, -inf }
 0x1de   : > { %375 = vmax.xlane.f32.xlu0 %v374_v15 }
 0x267   : > { %v376_v16 = vpop.xlane.xlu0 %375 }
 0x268   : > { %v377_v17 = vsub.f32 %v370_v13, %v376_v16 }
 0x26a   : > { %v378_v18 = vmul.f32 1.442695, %v377_v17 }
 0x26c   : > { %897 = vpow2.f32 %v378_v18 }
 0x279   : > { %v898_v19 = vpop.eup %897 }
 0x27a   : > { %381 = vrot.lane.b32.xlu0 %v898_v19, %s1005_s16 }
 0x2ec   : > { %v382_v20 = vpop.permute.xlu0 %381 }
 0x2ed   : > { %v385_v21 = vsel %vm384_vm4, %v382_v20, 0.0 }
 0x2ee   : > { %386 = vadd.xlane.f32.xlu1 %v385_v21 }
 0x377   : > { %v387_v23 = vpop.xlane.xlu1 %386 }
 0x378   : > { %899 = vrcp.f32 %v387_v23 }
 0x385   : > { %v900_v24 = vpop.eup %899 }
 0x386   : > { %v389_v25 = vmul.f32 %v900_v24, %v898_v19 }
 0x388   : > { %391 = vrot.lane.b32.xlu1 %v389_v25, %s1005_s16 }
 0x3fa   : > { %v392_v26 = vpop.permute.xlu1 %391 }
 0x3fb   : > { %820 = vmatmul.mubr.msk.f32.vlgmr.msra.gmra.mxu0 %vm393_vm6, %v392_v26 }
 0x3fc   : > { %834 = vmatpush3.msk.msra.mxu0 %vm396_vm5, %v219_v22  ;;  %835 = vmatprep.mubr.msk.f32.mxu0 %vm1004_vm1, %v1003_v2 }
 0x4bb   : > { %v466_v27 = vpop.f32.mrf.mxu0 }
 0x4bc   : > { %471 = vrot.lane.b32.xlu1 %v466_v27, %s1005_s16 }
 0x4bd   : > { %v821_v28 = vpop.f32.mrf.mxu0 }
 0x52e   : > { %v472_v29 = vpop.permute.xlu1 %471 }
 0x52f   : > { %v474_v30 = vadd.f32 %v472_v29, %v1165_v9 }
 0x531   : > { %v475_v31 = vmax.f32 %v474_v30, 0.0 }
 0x533   : > { %477 = vrot.lane.b32.xlu1 %v475_v31, %s1006_s17 }
 0x5a5   : > { %v478_v32 = vpop.permute.xlu1 %477 }
 0x5a6   : > { %831 = vmatmul.mubr.msk.f32.vlgmr.msra.gmra.mxu1 %vm225_vm2, %v478_v32 }
 0x666   : > { %v547_v33 = vpop.f32.mrf.mxu1 }
 0x667   : > { %v548_v34 = vadd.f32 %v765_v7, %v547_v33 }
 0x668   : > { %v832_v35 = vpop.f32.mrf.mxu1 }
 0x669   : > { %v771_v36 = vmul.f32 -1.442695, %v548_v34 }
 0x66b   : > { %901 = vpow2.f32 %v771_v36 }
 0x678   : > { %v902_v37 = vpop.eup %901 }
 0x679   : > { %v554_v38 = vadd.f32 1.0, %v902_v37 }
 0x67b   : > { %903 = vrcp.f32 %v554_v38 }
 0x688   : > { %v904_v39 = vpop.eup %903 }
 0x689   : > { %558 = vrot.lane.b32.xlu0 %v904_v39, %s1007_s20 }
 0x6fb   : > { %v559_v40 = vpop.permute.xlu0 %558 }
 0x6fc   : > { %v561_v41 = vmul.f32 %v559_v40, %v389_v25 }
 0x6fe   : > { %v564_v42 = vmul.f32 0.05, %v561_v41 }
 0x700   : > { %566 = vrot.lane.b32.xlu1 %v564_v42, %s1005_s16 }
 0x704   : > { %655 = vrot.lane.b32.xlu1 %v1152_v6, %s1008_s15 }
 0x772   : > { %v567_v45 = vpop.permute.xlu1 %566 }
 0x773   : > { %v569_v46 = vadd.f32 %v567_v45, %v563_v44 }
 0x775   : > { %570 = vst.msk [vmem:[#allocation2] sm:$0x3] %vm384_vm4, %v569_v46  ;;  %836 = vmatmul.mubr.msk.f32.vlgmr.msra.gmra.mxu0 %vm393_vm6, %v569_v46 }
 0x776   : > { %v656_v50 = vpop.permute.xlu1 %655 }
 0x835   : > { %v640_v47 = vpop.f32.mrf.mxu0 }
 0x836   : > { %645 = vrot.lane.b32.xlu0 %v640_v47, %s1005_s16 }
 0x837   : > { %v837_v48 = vpop.f32.mrf.mxu0 }
 0x8a8   : > { %v646_v49 = vpop.permute.xlu0 %645 }
 0x8a9   : > { %v648_v51 = vadd.f32 %v646_v49, %v1165_v9 }
 0x8ab   : > { %v658_v52 = vsub.f32 %v648_v51, %v656_v50  ;;  %650 = vrot.lane.b32.xlu0 %v648_v51, %s1008_s15 }
 0x8ad   : > { %660 = vrot.lane.b32.xlu1 %v658_v52, %s1006_s17 }
 0x8af   : > { %666 = vrot.lane.b32.xlu0 %v561_v41, %s1006_s17 }
 0x8b1   : > { %671 = vrot.lane.b32.xlu1 %v569_v46, %s1009_s21 }
 0x91d   : > { %v651_v53 = vpop.permute.xlu0 %650 }
 0x91e   : > { %654 = vst.msk [vmem:[%s1138_s11] sm:$0x3] %vm653_vm7, %v651_v53 }
 0x91f   : > { %v661_v54 = vpop.permute.xlu1 %660 }
 0x920   : > { %664 = vst.msk [vmem:[%s1138_s11] sm:$0x3] %vm663_vm8, %v661_v54 }
 0x921   : > { %v667_v55 = vpop.permute.xlu0 %666 }
 0x922   : > { %670 = vst.msk [vmem:[%s1138_s11] sm:$0x3] %vm669_vm9, %v667_v55 }
 0x923   : > { %v672_v56 = vpop.permute.xlu1 %671 }
 0x924   : > { %675 = vst.msk [vmem:[%s1138_s11] sm:$0x3] %vm674_vm10, %v672_v56 }
 0x925 PF: > { %p14_p8 = scmp.ge.s32.totalorder %s1075_s22, 6   ;;  %s1226_s12 = smov %s989_s13 }
 0x926   : > { %s1227_s13 = smov %s993_s14  ;;  %s1228_s14 = smov %s1092_s30 }
 0x927   : > { %s1229_s15 = smov %s1075_s22  ;;  %16 = sbr.rel (!%p14_p8) target bundleno = 4 (0x4), region = 81 }
 0x92c   :  { %695 = vsyncpa [#allocation4], 1 }
 0x92d   :  { %697 = vsyncpa [#allocation4 + $0x1], 1 }
 0x92e   :  { %698 = vsyncpa [#allocation6], 1 }
 0x92f   :  { %700 = vsyncpa [#allocation6 + $0x1], 1 }

</bundles_post_ra>
